<compile_context>
chip_gen: v5e
topology: v5e:2x2
jax: 0.10.0
libtpu: 0.0.40
codegen_flags: <defaults>
</compile_context>

<pallas_src>
import math
import functools

import jax
import jax.numpy as jnp
from jax.experimental import pallas as pl
from jax.experimental.pallas import tpu as pltpu

N_FILT = 20   # Conv1d(1, 20, K) as in the PyTorch module
LANES = 128


def _round_up(n, m):
    return -(-n // m) * m


def _cnn1d_kernel(x_ref, wp_ref, w1_ref, b1_ref, w2_ref, b2_ref, o_ref, *, pool):
    x = x_ref[...]                                        # (B, C+1) bf16
    # Fused conv + bias + max-pool: `pool` banded MXU matmuls + pairwise max.
    z = jnp.dot(x, wp_ref[0], preferred_element_type=jnp.float32)
    for j in range(1, pool):
        z = jnp.maximum(z, jnp.dot(x, wp_ref[j],
                                   preferred_element_type=jnp.float32))
    h = jnp.tanh(z).astype(jnp.bfloat16)                  # (B, F) flat features

    # fc1 + tanh (output padded to 128 lanes; padded cols stay exactly 0).
    h1 = jnp.tanh(jnp.dot(h, w1_ref[...], preferred_element_type=jnp.float32)
                  + b1_ref[...]).astype(jnp.bfloat16)     # (B, HPAD)

    # fc2 (128-lane padded output -> unmasked lane-dense store).
    o_ref[...] = (jnp.dot(h1, w2_ref[...], preferred_element_type=jnp.float32)
                  + b2_ref[...])


def cnn_1d_forward(x, params, *, input_channels, kernel_size, pool_size,
                   num_classes):
    """x: (B, input_channels, 1, 1) float32, matching the PyTorch forward."""
    conv_w, conv_b, fc1_w, fc1_b, fc2_w, fc2_b = params
    B = x.shape[0]
    C = input_channels
    K = kernel_size
    pool = pool_size
    L_conv = C - K + 1
    L_pool = L_conv // pool
    F = N_FILT * L_pool                       # PyTorch features_size
    H = fc1_w.shape[0]                        # 100
    HPAD = _round_up(H, LANES)
    OPAD = _round_up(num_classes, LANES)

    # ---- wrapper-side layout prep (pure XLA; hoisted / constant-folded) ----
    # squeeze(-1).squeeze(-1); append a ones column so the conv bias folds
    # into the banded matmul (no in-kernel broadcast add).
    x2 = x.reshape(B, C)
    x_aug = jnp.concatenate([x2, jnp.ones((B, 1), x2.dtype)],
                            axis=1).astype(jnp.bfloat16)              # (B, C+1)

    # Banded conv+pool weights stacked over the pool window: (pool, C+1, F).
    f_n = jnp.arange(F) // L_pool             # filter index per feature
    f_l = jnp.arange(F) % L_pool              # pooled position per feature
    c_idx = jnp.arange(C)[:, None]            # (C, 1)
    bias_row = conv_b[f_n][None, :]           # (1, F)
    bands = []
    for j in range(pool):
        p = f_l * pool + j                    # conv output position per feature
        tap = c_idx - p[None, :]              # (C, F) tap index into conv_w
        valid = (tap >= 0) & (tap < K)
        w = conv_w[f_n[None, :], jnp.clip(tap, 0, K - 1)]
        w = jnp.where(valid, w, 0.0)
        bands.append(jnp.concatenate([w, bias_row], axis=0))          # (C+1, F)
    wp = jnp.stack(bands, axis=0).astype(jnp.bfloat16)                # (pool, C+1, F)

    # fc1 / fc2: transpose + zero-pad output lanes to 128 (exact, since
    # padded rows/cols are zero).  bf16 weights halve the dominant DMA.
    w1p = jnp.zeros((F, HPAD), jnp.float32).at[:, :H].set(fc1_w.T)
    w1p = w1p.astype(jnp.bfloat16)
    b1p = jnp.zeros((1, HPAD), jnp.float32).at[:, :H].set(fc1_b)
    w2p = jnp.zeros((HPAD, OPAD), jnp.float32).at[:H, :num_classes].set(fc2_w.T)
    w2p = w2p.astype(jnp.bfloat16)
    b2p = jnp.zeros((1, OPAD), jnp.float32).at[:, :num_classes].set(fc2_b)

    kernel = functools.partial(_cnn1d_kernel, pool=pool)
    vmem = pl.BlockSpec(memory_space=pltpu.MemorySpace.VMEM)

    out = pl.pallas_call(
        kernel,
        out_shape=jax.ShapeDtypeStruct((B, OPAD), jnp.float32),
        in_specs=[vmem] * 6,
        out_specs=vmem,
    )(x_aug, wp, w1p, b1p, w2p, b2p)
    return out[:, :num_classes]


def _reference_forward(x, params, *, input_channels, kernel_size, pool_size):
    """Pure-JAX f32 reference mirroring the PyTorch forward (sanity check)."""
    conv_w, conv_b, fc1_w, fc1_b, fc2_w, fc2_b = params
    B = x.shape[0]
    xs = x.reshape(B, 1, input_channels)
    conv = jax.lax.conv_general_dilated(
        xs, conv_w[:, None, :], window_strides=(1,), padding="VALID",
        dimension_numbers=("NCH", "OIH", "NCH")) + conv_b[None, :, None]
    L_conv = conv.shape[-1]
    L_pool = L_conv // pool_size
    pooled = jax.lax.reduce_window(
        conv[:, :, :L_pool * pool_size], -jnp.inf, jax.lax.max,
        (1, 1, pool_size), (1, 1, pool_size), "VALID")
    h = jnp.tanh(pooled).reshape(B, -1)
    h1 = jnp.tanh(h @ fc1_w.T + fc1_b)
    return h1 @ fc2_w.T + fc2_b


if __name__ == "__main__":
    # Module hyper-parameters (small, consistent with the PyTorch __init__).
    input_channels = 64
    num_classes = 10
    batch = 4
    kernel_size = math.ceil(input_channels / 9)      # 8
    pool_size = math.ceil(kernel_size / 5)           # 2
    L_conv = input_channels - kernel_size + 1        # 57
    L_pool = L_conv // pool_size                     # 28
    features_size = N_FILT * L_pool                  # 560

    # Deterministic parameter init (weights U(-0.05, 0.05), zero biases).
    key = jax.random.PRNGKey(0)
    kx, kc, k1, k2 = jax.random.split(key, 4)
    x = jax.random.normal(kx, (batch, input_channels, 1, 1), jnp.float32)
    conv_w = jax.random.uniform(kc, (N_FILT, kernel_size), jnp.float32, -0.05, 0.05)
    conv_b = jnp.zeros((N_FILT,), jnp.float32)
    fc1_w = jax.random.uniform(k1, (100, features_size), jnp.float32, -0.05, 0.05)
    fc1_b = jnp.zeros((100,), jnp.float32)
    fc2_w = jax.random.uniform(k2, (num_classes, 100), jnp.float32, -0.05, 0.05)
    fc2_b = jnp.zeros((num_classes,), jnp.float32)
    params = (conv_w, conv_b, fc1_w, fc1_b, fc2_w, fc2_b)

    out = cnn_1d_forward(x, params,
                         input_channels=input_channels,
                         kernel_size=kernel_size,
                         pool_size=pool_size,
                         num_classes=num_classes)
    out = jax.block_until_ready(out)
    assert out.shape == (batch, num_classes), out.shape

    ref = _reference_forward(x, params,
                             input_channels=input_channels,
                             kernel_size=kernel_size,
                             pool_size=pool_size)
    # bf16 MXU operands with f32 accumulation -> small rounding vs f32 ref.
    assert jnp.allclose(out, ref, atol=5e-3, rtol=5e-3), (
        float(jnp.max(jnp.abs(out - ref))))

    print("KERNEL_OK")
</pallas_src>

<mosaic_0001>
module attributes {stable_mosaic.version = 11 : i64} {
  func.func @_cnn1d_kernel(%arg0: memref<4x65xbf16, #tpu.memory_space<vmem>>, %arg1: memref<2x65x560xbf16, #tpu.memory_space<vmem>>, %arg2: memref<560x128xbf16, #tpu.memory_space<vmem>>, %arg3: memref<1x128xf32, #tpu.memory_space<vmem>>, %arg4: memref<128x128xbf16, #tpu.memory_space<vmem>>, %arg5: memref<1x128xf32, #tpu.memory_space<vmem>>, %arg6: memref<4x128xf32, #tpu.memory_space<vmem>>) attributes {dimension_semantics = [], scalar_prefetch = 0 : i64, scratch_operands = 0 : i64, tpu.core_type = #tpu.core_type<tc>} {
    %c0 = arith.constant 0 : index
    %c0_0 = arith.constant 0 : index
    %0 = vector.load %arg0[%c0, %c0_0] : memref<4x65xbf16, #tpu.memory_space<vmem>>, vector<4x65xbf16>
    %c0_1 = arith.constant 0 : index
    %c0_2 = arith.constant 0 : index
    %c0_3 = arith.constant 0 : index
    %1 = vector.load %arg1[%c0_1, %c0_2, %c0_3] : memref<2x65x560xbf16, #tpu.memory_space<vmem>>, vector<1x65x560xbf16>
    %2 = vector.shape_cast %1 : vector<1x65x560xbf16> to vector<65x560xbf16>
    %cst = arith.constant dense<0.000000e+00> : vector<4x560xf32>
    %3 = tpu.matmul %0, %2, %cst {dimension_numbers = #tpu.dot_dimension_numbers<[1], [0], [0], [1], [0, 0, 1, 1], [], []>} : vector<4x65xbf16>, vector<65x560xbf16>, vector<4x560xf32> -> vector<4x560xf32>
    %c1 = arith.constant 1 : index
    %c0_4 = arith.constant 0 : index
    %c0_5 = arith.constant 0 : index
    %4 = vector.load %arg1[%c1, %c0_4, %c0_5] : memref<2x65x560xbf16, #tpu.memory_space<vmem>>, vector<1x65x560xbf16>
    %5 = vector.shape_cast %4 : vector<1x65x560xbf16> to vector<65x560xbf16>
    %cst_6 = arith.constant dense<0.000000e+00> : vector<4x560xf32>
    %6 = tpu.matmul %0, %5, %cst_6 {dimension_numbers = #tpu.dot_dimension_numbers<[1], [0], [0], [1], [0, 0, 1, 1], [], []>} : vector<4x65xbf16>, vector<65x560xbf16>, vector<4x560xf32> -> vector<4x560xf32>
    %7 = arith.maximumf %3, %6 : vector<4x560xf32>
    %8 = math.tanh %7 : vector<4x560xf32>
    %9 = arith.truncf %8 : vector<4x560xf32> to vector<4x560xbf16>
    %c0_7 = arith.constant 0 : index
    %c0_8 = arith.constant 0 : index
    %10 = vector.load %arg2[%c0_7, %c0_8] : memref<560x128xbf16, #tpu.memory_space<vmem>>, vector<560x128xbf16>
    %cst_9 = arith.constant dense<0.000000e+00> : vector<4x128xf32>
    %11 = tpu.matmul %9, %10, %cst_9 {dimension_numbers = #tpu.dot_dimension_numbers<[1], [0], [0], [1], [0, 0, 1, 1], [], []>} : vector<4x560xbf16>, vector<560x128xbf16>, vector<4x128xf32> -> vector<4x128xf32>
    %c0_10 = arith.constant 0 : index
    %c0_11 = arith.constant 0 : index
    %12 = vector.load %arg3[%c0_10, %c0_11] : memref<1x128xf32, #tpu.memory_space<vmem>>, vector<1x128xf32>
    %13 = vector.broadcast %12 : vector<1x128xf32> to vector<4x128xf32>
    %14 = arith.addf %11, %13 : vector<4x128xf32>
    %15 = math.tanh %14 : vector<4x128xf32>
    %16 = arith.truncf %15 : vector<4x128xf32> to vector<4x128xbf16>
    %c0_12 = arith.constant 0 : index
    %c0_13 = arith.constant 0 : index
    %17 = vector.load %arg4[%c0_12, %c0_13] : memref<128x128xbf16, #tpu.memory_space<vmem>>, vector<128x128xbf16>
    %cst_14 = arith.constant dense<0.000000e+00> : vector<4x128xf32>
    %18 = tpu.matmul %16, %17, %cst_14 {dimension_numbers = #tpu.dot_dimension_numbers<[1], [0], [0], [1], [0, 0, 1, 1], [], []>} : vector<4x128xbf16>, vector<128x128xbf16>, vector<4x128xf32> -> vector<4x128xf32>
    %c0_15 = arith.constant 0 : index
    %c0_16 = arith.constant 0 : index
    %19 = vector.load %arg5[%c0_15, %c0_16] : memref<1x128xf32, #tpu.memory_space<vmem>>, vector<1x128xf32>
    %20 = vector.broadcast %19 : vector<1x128xf32> to vector<4x128xf32>
    %21 = arith.addf %18, %20 : vector<4x128xf32>
    %c0_17 = arith.constant 0 : index
    %c0_18 = arith.constant 0 : index
    %22 = vector.load %arg6[%c0_17, %c0_18] : memref<4x128xf32, #tpu.memory_space<vmem>>, vector<4x128xf32>
    tpu.vector_store %arg6[%c0_17, %c0_18], %21 {strides = array<i32>} : memref<4x128xf32, #tpu.memory_space<vmem>>, vector<4x128xf32>,
    return
  }
}

</mosaic_0001>

<bundles_post_ra>
// kernel: tpu_custom_call.1
= control target key start
LH: loop header
LB: loop body
LE: loop exit
PB: predicated region body
PF: predicated region fallthrough
CT: control target
= control target key end

     0   :  { %vm174_vm0 = vcmask 1040384   ;;  %v1445_v5 = vmov 0   ;;  %vm170_vm1 = vcmask 531456   ;;  %s1919_s0 = inlined_call_operand.vmem [shape: bf16[4,65], index: 0, kind: input, shape index: {}]   ;;  %s1920_s1 = inlined_call_operand.vmem [shape: bf16[2,65,560], index: 1, kind: input, shape index: {}]   ;;  %s1921_s2 = inlined_call_operand.vmem [shape: bf16[560,128], index: 2, kind: input, shape index: {}]   ;;  %s1922_s3 = inlined_call_operand.vmem [shape: f32[1,128], index: 3, kind: input, shape index: {}]   ;;  %s1923_s4 = inlined_call_operand.vmem [shape: bf16[128,128], index: 4, kind: input, shape index: {}]   ;;  %s1924_s5 = inlined_call_operand.vmem [shape: f32[1,128], index: 5, kind: input, shape index: {}]   ;;  %s1925_s6 = inlined_call_operand.hbm [shape: f32[4,128], index: 6, kind: output, shape index: {}]  }
   0x1   :  { %v50_v0 = vld [vmem:[%s1920_s1 + $0xa0] sm:$0x11]  ;;  %v51_v1 = vld [vmem:[%s1920_s1 + $0xa8] sm:$0x11]  ;;  %v1488_v6 = vsel %vm174_vm0, 65535, %v1445_v5 }
   0x2   :  { %v120_v2 = vunpack.c.l.b16 %v50_v0  ;;  %v121_v3 = vunpack.c.h.b16 %v50_v0  ;;  %v122_v4 = vunpack.c.l.b16 %v51_v1  ;;  %v123_v7 = vunpack.c.h.b16 %v51_v1  ;;  %v1012_v11 = vld [vmem:[%s1920_s1 + $0x78] sm:$0xf]  ;;  %v1337_v12 = vld [vmem:[%s1920_s1 + $0x88] sm:$0xf0]  ;;  %v1335_v14 = vld [vmem:[%s1920_s1 + $0x7c] sm:$0xf] }
   0x3   :  { %v1014_v15 = vld [vmem:[%s1920_s1 + $0x8c] sm:$0xf0]  ;;  %v1020_v16 = vld [vmem:[%s1920_s1 + $0x80] sm:$0xf]  ;;  %v1338_v20 = vld [vmem:[%s1920_s1 + $0x90] sm:$0xf0]  ;;  %v1013_v24 = vor.u32 %v1337_v12, %v1012_v11 }
   0x4   :  { %v145_v8 = vpack.c.b16 %v120_v2, %v120_v2  ;;  %v146_v9 = vpack.c.b16 %v121_v3, %v121_v3  ;;  %v147_v10 = vpack.c.b16 %v122_v4, %v122_v4  ;;  %v148_v13 = vpack.c.b16 %v123_v7, %v123_v7  ;;  %v1336_v21 = vld [vmem:[%s1920_s1 + $0x84] sm:$0xf]  ;;  %v1022_v22 = vld [vmem:[%s1920_s1 + $0x94] sm:$0xf0]  ;;  %v992_v26 = vld [vmem:[%s1920_s1 + $0x50] sm:$0xf] }
   0x5   :  { %v1017_v25 = vor.u32 %v1335_v14, %v1014_v15  ;;  %v1332_v27 = vld [vmem:[%s1920_s1 + $0x60] sm:$0xf0]  ;;  %v1021_v28 = vor.u32 %v1338_v20, %v1020_v16  ;;  %v1025_v29 = vor.u32 %v1336_v21, %v1022_v22  ;;  %v1330_v30 = vld [vmem:[%s1920_s1 + $0x54] sm:$0xf]  ;;  %v994_v31 = vld [vmem:[%s1920_s1 + $0x64] sm:$0xf0] }
   0x6   :  { %v178_v17 = vand.u32 %v1488_v6, %v145_v8  ;;  %v181_v18 = vand.u32 %v1488_v6, %v146_v9  ;;  %v184_v19 = vand.u32 %v1488_v6, %v147_v10  ;;  %v187_v23 = vand.u32 %v1488_v6, %v148_v13  ;;  %v1000_v32 = vld [vmem:[%s1920_s1 + $0x58] sm:$0xf]  ;;  %v1333_v33 = vld [vmem:[%s1920_s1 + $0x68] sm:$0xf0]  ;;  %v1331_v34 = vld [vmem:[%s1920_s1 + $0x5c] sm:$0xf] }
   0x7   :  { %v1002_v35 = vld [vmem:[%s1920_s1 + $0x6c] sm:$0xf0]  ;;  %v972_v36 = vld [vmem:[%s1920_s1 + $0x28] sm:$0xf]  ;;  %v1327_v37 = vld [vmem:[%s1920_s1 + $0x38] sm:$0xf0]  ;;  %v993_v38 = vor.u32 %v1332_v27, %v992_v26  ;;  %v997_v39 = vor.u32 %v1330_v30, %v994_v31  ;;  %v1001_v43 = vor.u32 %v1333_v33, %v1000_v32 }
   0x8   :  { %195 = vmatpush.bf16.msra.mxu0 %v178_v17  ;;  %208 = vmatpush.bf16.msra.mxu1 %v181_v18  ;;  %v1325_v40 = vld [vmem:[%s1920_s1 + $0x2c] sm:$0xf]  ;;  %v974_v41 = vld [vmem:[%s1920_s1 + $0x3c] sm:$0xf0]  ;;  %v980_v42 = vld [vmem:[%s1920_s1 + $0x30] sm:$0xf]  ;;  %v1005_v44 = vor.u32 %v1331_v34, %v1002_v35  ;;  %v973_v55 = vor.u32 %v1327_v37, %v972_v36 }
   0x9   :  { %221 = vmatpush.bf16.msra.mxu2 %v184_v19  ;;  %234 = vmatpush.bf16.msra.mxu3 %v187_v23  ;;  %v52_v45 = vld [vmem:[%s1920_s1 + $0xb0] sm:$0x1]  ;;  %v1059_v46 = vld [vmem:[%s1920_s1 + $0x154] sm:$0x11]  ;;  %v1566_v47 = vld [vmem:[%s1920_s1 + $0x15c] sm:$0x11]  ;;  %v977_v56 = vor.u32 %v1325_v40, %v974_v41 }
   0xa   :  { %v1328_v48 = vld [vmem:[%s1920_s1 + $0x40] sm:$0xf0]  ;;  %v1326_v49 = vld [vmem:[%s1920_s1 + $0x34] sm:$0xf]  ;;  %v982_v50 = vld [vmem:[%s1920_s1 + $0x44] sm:$0xf0]  ;;  %v124_v51 = vunpack.c.l.b16 %v52_v45  ;;  %v352_v52 = vunpack.c.l.b16 %v1059_v46  ;;  %v353_v53 = vunpack.c.h.b16 %v1059_v46  ;;  %v354_v54 = vunpack.c.l.b16 %v1566_v47 }
   0xb   :  { %v952_v57 = vld [vmem:[%s1920_s1] sm:$0xf]  ;;  %v1322_v58 = vld [vmem:[%s1920_s1 + $0x10] sm:$0xf0]  ;;  %v981_v59 = vor.u32 %v1328_v48, %v980_v42  ;;  %v985_v60 = vor.u32 %v1326_v49, %v982_v50  ;;  %v1320_v61 = vld [vmem:[%s1920_s1 + $0x4] sm:$0xf]  ;;  %v355_v49 = vunpack.c.h.b16 %v1566_v47 }
   0xc   :  { %196 = vmatpush.bf16.msra.mxu0 %v1013_v24  ;;  %209 = vmatpush.bf16.msra.mxu1 %v1017_v25  ;;  %v954_v62 = vld [vmem:[%s1920_s1 + $0x14] sm:$0xf0]  ;;  %v960_v63 = vld [vmem:[%s1920_s1 + $0x8] sm:$0xf]  ;;  %v1323_v0 = vld [vmem:[%s1920_s1 + $0x18] sm:$0xf0]  ;;  %v149_v3 = vpack.c.b16 %v124_v51, %v124_v51  ;;  %v377_v4 = vpack.c.b16 %v352_v52, %v352_v52  ;;  %v378_v5 = vpack.c.b16 %v353_v53, %v353_v53 }
   0xd   :  { %222 = vmatpush.bf16.msra.mxu2 %v1021_v28  ;;  %235 = vmatpush.bf16.msra.mxu3 %v1025_v29  ;;  %v1321_v1 = vld [vmem:[%s1920_s1 + $0xc] sm:$0xf]  ;;  %v962_v2 = vld [vmem:[%s1920_s1 + $0x1c] sm:$0xf0]  ;;  %v379_v7 = vpack.c.b16 %v354_v54, %v354_v54  ;;  %v953_v8 = vor.u32 %v1322_v58, %v952_v57  ;;  %v957_v9 = vor.u32 %v1320_v61, %v954_v62  ;;  %v1028_v14 = vld [vmem:[%s1920_s1 + $0x88] sm:$0xf] }
   0xe   :  { %v961_v10 = vor.u32 %v1323_v0, %v960_v63  ;;  %v965_v11 = vor.u32 %v1321_v1, %v962_v2  ;;  %v190_v12 = vand.u32 %v1488_v6, %v149_v3  ;;  %v403_v13 = vand.u32 %v377_v4, %v1488_v6  ;;  %v1339_v15 = vld [vmem:[%s1920_s1 + $0x98] sm:$0xf0]  ;;  %v1124_v18 = vld [vmem:[%s1920_s1 + $0x12c] sm:$0xf]  ;;  %v1357_v19 = vld [vmem:[%s1920_s1 + $0x13c] sm:$0xf0] }
   0xf   :  { %v406_v16 = vand.u32 %v378_v5, %v1488_v6  ;;  %v409_v17 = vand.u32 %v379_v7, %v1488_v6  ;;  %v1355_v20 = vld [vmem:[%s1920_s1 + $0x130] sm:$0xf]  ;;  %v1126_v21 = vld [vmem:[%s1920_s1 + $0x140] sm:$0xf0]  ;;  %v1132_v22 = vld [vmem:[%s1920_s1 + $0x134] sm:$0xf]  ;;  %v1029_v25 = vor.u32 %v1339_v15, %v1028_v14  ;;  %v1125_v26 = vor.u32 %v1357_v19, %v1124_v18 }
  0x10   :  { %197 = vmatpush.bf16.msra.mxu0 %v993_v38  ;;  %210 = vmatpush.bf16.msra.mxu1 %v997_v39  ;;  %v1358_v23 = vld [vmem:[%s1920_s1 + $0x144] sm:$0xf0]  ;;  %v1633_v24 = vld [vmem:[%s1919_s0] sm:$0x3]  ;;  %v1334_v28 = vld [vmem:[%s1920_s1 + $0x70] sm:$0xf0]  ;;  %v1129_v29 = vor.u32 %v1355_v20, %v1126_v21 }
  0x11   :  { %223 = vmatpush.bf16.msra.mxu2 %v1001_v43  ;;  %236 = vmatpush.bf16.msra.mxu3 %v1005_v44  ;;  %v1008_v27 = vld [vmem:[%s1920_s1 + $0x60] sm:$0xf]  ;;  %v1133_v30 = vor.u32 %v1358_v23, %v1132_v22  ;;  %v1104_v31 = vld [vmem:[%s1920_s1 + $0x104] sm:$0xf]  ;;  %v1352_v32 = vld [vmem:[%s1920_s1 + $0x114] sm:$0xf0] }
  0x12   :  { %v1350_v33 = vld [vmem:[%s1920_s1 + $0x108] sm:$0xf]  ;;  %v1106_v34 = vld [vmem:[%s1920_s1 + $0x118] sm:$0xf0]  ;;  %v1112_v35 = vld [vmem:[%s1920_s1 + $0x10c] sm:$0xf]  ;;  %v1009_v40 = vor.u32 %v1334_v28, %v1008_v27  ;;  %v1105_v41 = vor.u32 %v1352_v32, %v1104_v31 }
  0x13   :  { %v1353_v36 = vld [vmem:[%s1920_s1 + $0x11c] sm:$0xf0]  ;;  %v988_v37 = vld [vmem:[%s1920_s1 + $0x38] sm:$0xf]  ;;  %v1329_v38 = vld [vmem:[%s1920_s1 + $0x48] sm:$0xf0]  ;;  %v1109_v45 = vor.u32 %v1350_v33, %v1106_v34 }
  0x14   :  { %198 = vmatpush.bf16.msra.mxu0 %v973_v55  ;;  %211 = vmatpush.bf16.msra.mxu1 %v977_v56  ;;  %v1061_v39 = vld [vmem:[%s1920_s1 + $0x164] sm:$0x1]  ;;  %v1084_v42 = vld [vmem:[%s1920_s1 + $0xdc] sm:$0xf]  ;;  %v1347_v43 = vld [vmem:[%s1920_s1 + $0xec] sm:$0xf0]  ;;  %v1113_v46 = vor.u32 %v1353_v36, %v1112_v35 }
  0x15   :  { %224 = vmatpush.bf16.msra.mxu2 %v981_v59  ;;  %237 = vmatpush.bf16.msra.mxu3 %v985_v60  ;;  %v1345_v44 = vld [vmem:[%s1920_s1 + $0xe0] sm:$0xf]  ;;  %v1086_v48 = vld [vmem:[%s1920_s1 + $0xf0] sm:$0xf0]  ;;  %v1092_v50 = vld [vmem:[%s1920_s1 + $0xe4] sm:$0xf]  ;;  %v356_v52 = vunpack.c.l.b16 %v1061_v39 }
  0x16   :  { %v1348_v51 = vld [vmem:[%s1920_s1 + $0xf4] sm:$0xf0] }
  0x18   :  { %199 = vmatpush.bf16.msra.mxu0 %v953_v8  ;;  %212 = vmatpush.bf16.msra.mxu1 %v957_v9 }
  0x19   :  { %225 = vmatpush.bf16.msra.mxu2 %v961_v10  ;;  %238 = vmatpush.bf16.msra.mxu3 %v965_v11 }
  0x1b   :  { %1030 = vmatmul.msk.bf16.vlgmr.msra.gmra.mxu0 %vm170_vm1, %v1633_v24  ;;  %1031 = vmatmul.msk.bf16.vlgmr.msra.gmra.mxu1 %vm170_vm1, %v1633_v24 }
  0x1c   :  { %247 = vmatpush.bf16.msrb.mxu0 %v190_v12  ;;  %420 = vmatpush.bf16.msrb.mxu1 %v403_v13 }
  0x1d   :  { %433 = vmatpush.bf16.msrb.mxu2 %v406_v16  ;;  %446 = vmatpush.bf16.msrb.mxu3 %v409_v17 }
  0x1e   :  { %1032 = vmatmul.msk.bf16.vlgmr.msra.gmra.mxu2 %vm170_vm1, %v1633_v24  ;;  %1033 = vmatmul.msk.bf16.vlgmr.msra.gmra.mxu3 %vm170_vm1, %v1633_v24 }
  0x20   :  { %248 = vmatpush.bf16.msrb.mxu0 %v1029_v25  ;;  %421 = vmatpush.bf16.msrb.mxu1 %v1125_v26 }
  0x21   :  { %434 = vmatpush.bf16.msrb.mxu2 %v1129_v29  ;;  %447 = vmatpush.bf16.msrb.mxu3 %v1133_v30 }
  0x22   :  { %11 = vsyncpa [#allocation3], 0  ;;  %v989_v53 = vor.u32 %v1329_v38, %v988_v37  ;;  %v1085_v54 = vor.u32 %v1347_v43, %v1084_v42  ;;  %v968_v55 = vld [vmem:[%s1920_s1 + $0x10] sm:$0xf]  ;;  %v1324_v47 = vld [vmem:[%s1920_s1 + $0x20] sm:$0xf0]  ;;  %v1089_v56 = vor.u32 %v1345_v44, %v1086_v48  ;;  %v1093_v57 = vor.u32 %v1348_v51, %v1092_v50 }
  0x23   :  { %v1064_v58 = vld [vmem:[%s1920_s1 + $0xb4] sm:$0xf]  ;;  %v1342_v59 = vld [vmem:[%s1920_s1 + $0xc4] sm:$0xf0]  ;;  %v1340_v60 = vld [vmem:[%s1920_s1 + $0xb8] sm:$0xf]  ;;  %v380_v61 = vpack.c.b16 %v355_v49, %v355_v49  ;;  %v381_v1 = vpack.c.b16 %v356_v52, %v356_v52  ;;  %v969_v2 = vor.u32 %v1324_v47, %v968_v55 }
  0x24   :  { %249 = vmatpush.bf16.msrb.mxu0 %v1009_v40  ;;  %422 = vmatpush.bf16.msrb.mxu1 %v1105_v41  ;;  %v1066_v62 = vld [vmem:[%s1920_s1 + $0xc8] sm:$0xf0]  ;;  %v1072_v63 = vld [vmem:[%s1920_s1 + $0xbc] sm:$0xf]  ;;  %v1343_v0 = vld [vmem:[%s1920_s1 + $0xcc] sm:$0xf0]  ;;  %v1065_v3 = vor.u32 %v1342_v59, %v1064_v58 }
  0x25   :  { %435 = vmatpush.bf16.msrb.mxu2 %v1109_v45  ;;  %448 = vmatpush.bf16.msrb.mxu3 %v1113_v46  ;;  %v1069_v4 = vor.u32 %v1340_v60, %v1066_v62  ;;  %v1073_v5 = vor.u32 %v1343_v0, %v1072_v63  ;;  %v412_v7 = vand.u32 %v380_v61, %v1488_v6  ;;  %v1356_v9 = vld [vmem:[%s1920_s1 + $0x138] sm:$0xf]  ;;  %v1134_v10 = vld [vmem:[%s1920_s1 + $0x148] sm:$0xf0]  ;;  %v1140_v11 = vld [vmem:[%s1920_s1 + $0x13c] sm:$0xf] }
  0x26   :  { %v415_v8 = vand.u32 %v381_v1, %v1488_v6  ;;  %v1359_v12 = vld [vmem:[%s1920_s1 + $0x14c] sm:$0xf0]  ;;  %v1367_v6 = vld [vmem:[%s1921_s2 + $0x38] sm:$0xff]  ;;  %v1137_v13 = vor.u32 %v1356_v9, %v1134_v10  ;;  %v1114_v16 = vld [vmem:[%s1920_s1 + $0x120] sm:$0xf0]  ;;  %vm781_vm2 = vcmask 392192  }
  0x27   :  { %v1141_v14 = vor.u32 %v1359_v12, %v1140_v11  ;;  %v1351_v15 = vld [vmem:[%s1920_s1 + $0x110] sm:$0xf]  ;;  %v1120_v17 = vld [vmem:[%s1920_s1 + $0x114] sm:$0xf]  ;;  %v1354_v18 = vld [vmem:[%s1920_s1 + $0x124] sm:$0xf0] }
  0x28   :  { %250 = vmatpush.bf16.msrb.mxu0 %v989_v53  ;;  %423 = vmatpush.bf16.msrb.mxu1 %v1085_v54  ;;  %v1117_v19 = vor.u32 %v1351_v15, %v1114_v16  ;;  %v1121_v20 = vor.u32 %v1354_v18, %v1120_v17  ;;  %v1346_v21 = vld [vmem:[%s1920_s1 + $0xe8] sm:$0xf]  ;;  %v1094_v22 = vld [vmem:[%s1920_s1 + $0xf8] sm:$0xf0]  ;;  %v1100_v23 = vld [vmem:[%s1920_s1 + $0xec] sm:$0xf] }
  0x29   :  { %436 = vmatpush.bf16.msrb.mxu2 %v1089_v56  ;;  %449 = vmatpush.bf16.msrb.mxu3 %v1093_v57  ;;  %v1349_v25 = vld [vmem:[%s1920_s1 + $0xfc] sm:$0xf0]  ;;  %v1097_v26 = vor.u32 %v1346_v21, %v1094_v22  ;;  %v1074_v29 = vld [vmem:[%s1920_s1 + $0xd0] sm:$0xf0]  ;;  %v1080_v30 = vld [vmem:[%s1920_s1 + $0xc4] sm:$0xf] }
  0x2a   :  { %v1101_v27 = vor.u32 %v1349_v25, %v1100_v23  ;;  %v1341_v28 = vld [vmem:[%s1920_s1 + $0xc0] sm:$0xf]  ;;  %v1344_v31 = vld [vmem:[%s1920_s1 + $0xd4] sm:$0xf0]  ;;  %v1366_v34 = vld [vmem:[%s1921_s2 + $0x30] sm:$0xff]  ;;  %s941_s11 = sshll.u32 %s1925_s6, 4  ;;  %s942_s11 = int_to_ptr.hbm [resolvable:$true] %s941_s11 }
  0x2b   :  { %v1077_v32 = vor.u32 %v1341_v28, %v1074_v29  ;;  %v1081_v33 = vor.u32 %v1344_v31, %v1080_v30  ;;  %v1375_v35 = vld [vmem:[%s1921_s2 + $0x78] sm:$0xff]  ;;  %v1365_v37 = vld [vmem:[%s1921_s2 + $0x28] sm:$0xff]  ;;  %v1382_v38 = vld [vmem:[%s1921_s2 + $0xb0] sm:$0xff] }
  0x2c   :  { %251 = vmatpush.bf16.msrb.mxu0 %v969_v2  ;;  %424 = vmatpush.bf16.msrb.mxu1 %v1065_v3  ;;  %v1383_v36 = vld [vmem:[%s1921_s2 + $0xb8] sm:$0xff]  ;;  %v1364_v39 = vld [vmem:[%s1921_s2 + $0x20] sm:$0xff]  ;;  %v1373_v40 = vld [vmem:[%s1921_s2 + $0x68] sm:$0xff] }
  0x2d   :  { %437 = vmatpush.bf16.msrb.mxu2 %v1069_v4  ;;  %450 = vmatpush.bf16.msrb.mxu3 %v1073_v5  ;;  %v1381_v41 = vld [vmem:[%s1921_s2 + $0xa8] sm:$0xff]  ;;  %v1363_v42 = vld [vmem:[%s1921_s2 + $0x18] sm:$0xff]  ;;  %v1372_v44 = vld [vmem:[%s1921_s2 + $0x60] sm:$0xff] }
  0x2e   :  { %v1391_v43 = vld [vmem:[%s1921_s2 + $0xf8] sm:$0xff]  ;;  %v1380_v45 = vld [vmem:[%s1921_s2 + $0xa0] sm:$0xff]  ;;  %v1362_v46 = vld [vmem:[%s1921_s2 + $0x10] sm:$0xff] }
  0x2f   :  { %1034 = vmatmul.msk.bf16.vlgmr.msrb.gmra.mxu0 %vm170_vm1, %v1633_v24  ;;  %1142 = vmatmul.msk.bf16.vlgmr.msrb.gmra.mxu1 %vm170_vm1, %v1633_v24  ;;  %v1390_v48 = vld [vmem:[%s1921_s2 + $0xf0] sm:$0xff]  ;;  %v1371_v49 = vld [vmem:[%s1921_s2 + $0x58] sm:$0xff]  ;;  %v1361_v51 = vld [vmem:[%s1921_s2 + $0x8] sm:$0xff] }
  0x30   :  { %459 = vmatpush.bf16.msra.mxu0 %v412_v7  ;;  %472 = vmatpush.bf16.msra.mxu1 %v415_v8  ;;  %v1379_v50 = vld [vmem:[%s1921_s2 + $0x98] sm:$0xff]  ;;  %v1389_v52 = vld [vmem:[%s1921_s2 + $0xe8] sm:$0xff]  ;;  %v1370_v53 = vld [vmem:[%s1921_s2 + $0x50] sm:$0xff] }
  0x31   :  { %1143 = vmatmul.msk.bf16.vlgmr.msrb.gmra.mxu2 %vm170_vm1, %v1633_v24  ;;  %1144 = vmatmul.msk.bf16.vlgmr.msrb.gmra.mxu3 %vm170_vm1, %v1633_v24  ;;  %v1378_v54 = vld [vmem:[%s1921_s2 + $0x90] sm:$0xff]  ;;  %v1360_v55 = vld [vmem:[%s1921_s2] sm:$0xff]  ;;  %v1369_v56 = vld [vmem:[%s1921_s2 + $0x48] sm:$0xff] }
  0x32   :  { %785 = vmatpush.bf16.msra.mxu2 %v1367_v6  ;;  %798 = vmatpush.bf16.msra.mxu3 %v1375_v35  ;;  %v1388_v47 = vld [vmem:[%s1921_s2 + $0xe0] sm:$0xff]  ;;  %v1377_v57 = vld [vmem:[%s1921_s2 + $0x88] sm:$0xff]  ;;  %v1387_v58 = vld [vmem:[%s1921_s2 + $0xd8] sm:$0xff] }
  0x33   :  { %v1368_v61 = vld [vmem:[%s1921_s2 + $0x40] sm:$0xff]  ;;  %v1394_v63 = vld [vmem:[%s1921_s2 + $0x110] sm:$0xff]  ;;  %v1393_v3 = vld [vmem:[%s1921_s2 + $0x108] sm:$0xff] }
  0x34   :  { %460 = vmatpush.bf16.msra.mxu0 %v1137_v13  ;;  %473 = vmatpush.bf16.msra.mxu1 %v1141_v14  ;;  %v1376_v62 = vld [vmem:[%s1921_s2 + $0x80] sm:$0xff]  ;;  %v1386_v0 = vld [vmem:[%s1921_s2 + $0xd0] sm:$0xff]  ;;  %v1385_v4 = vld [vmem:[%s1921_s2 + $0xc8] sm:$0xff] }
  0x35   :  { %v1392_v8 = vld [vmem:[%s1921_s2 + $0x100] sm:$0xff]  ;;  %v1402_v12 = vld [vmem:[%s1923_s4 + $0x38] sm:$0xff] }
  0x36   :  { %786 = vmatpush.bf16.msra.mxu2 %v1366_v34  ;;  %v1384_v9 = vld [vmem:[%s1921_s2 + $0xc0] sm:$0xff] }
  0x38   :  { %461 = vmatpush.bf16.msra.mxu0 %v1117_v19  ;;  %474 = vmatpush.bf16.msra.mxu1 %v1121_v20 }
  0x3a   :  { %787 = vmatpush.bf16.msra.mxu2 %v1365_v37 }
  0x3c   :  { %462 = vmatpush.bf16.msra.mxu0 %v1097_v26  ;;  %475 = vmatpush.bf16.msra.mxu1 %v1101_v27 }
  0x3e   :  { %788 = vmatpush.bf16.msra.mxu2 %v1364_v39  ;;  %v1401_v39 = vld [vmem:[%s1923_s4 + $0x30] sm:$0xff] }
  0x40   :  { %463 = vmatpush.bf16.msra.mxu0 %v1077_v32  ;;  %476 = vmatpush.bf16.msra.mxu1 %v1081_v33 }
  0x42   :  { %789 = vmatpush.bf16.msra.mxu2 %v1363_v42  ;;  %v1398_v42 = vld [vmem:[%s1923_s4 + $0x18] sm:$0xff] }
  0x43   :  { %1145 = vmatmul.msk.bf16.vlgmr.msra.gmra.mxu0 %vm170_vm1, %v1633_v24  ;;  %1146 = vmatmul.msk.bf16.vlgmr.msra.gmra.mxu1 %vm170_vm1, %v1633_v24  ;;  %v1374_v24 = vld [vmem:[%s1921_s2 + $0x70] sm:$0xff] }
  0x44   :  { %811 = vmatpush.bf16.msrb.mxu0 %v1383_v36  ;;  %799 = vmatpush.bf16.msra.mxu3 %v1374_v24 }
  0x45   :  { %824 = vmatpush.bf16.msrb.mxu1 %v1391_v43  ;;  %v1397_v43 = vld [vmem:[%s1923_s4 + $0x10] sm:$0xff] }
  0x46   :  { %790 = vmatpush.bf16.msra.mxu2 %v1362_v46 }
  0x48   :  { %812 = vmatpush.bf16.msrb.mxu0 %v1382_v38  ;;  %800 = vmatpush.bf16.msra.mxu3 %v1373_v40  ;;  %v1400_v40 = vld [vmem:[%s1923_s4 + $0x28] sm:$0xff] }
  0x49   :  { %825 = vmatpush.bf16.msrb.mxu1 %v1390_v48 }
  0x4a   :  { %791 = vmatpush.bf16.msra.mxu2 %v1361_v51 }
  0x4c   :  { %813 = vmatpush.bf16.msrb.mxu0 %v1381_v41  ;;  %801 = vmatpush.bf16.msra.mxu3 %v1372_v44  ;;  %v1399_v41 = vld [vmem:[%s1923_s4 + $0x20] sm:$0xff]  ;;  %v1396_v44 = vld [vmem:[%s1923_s4 + $0x8] sm:$0xff] }
  0x4d   :  { %826 = vmatpush.bf16.msrb.mxu1 %v1389_v52 }
  0x4e   :  { %792 = vmatpush.bf16.msra.mxu2 %v1360_v55 }
  0x50   :  { %814 = vmatpush.bf16.msrb.mxu0 %v1380_v45  ;;  %802 = vmatpush.bf16.msra.mxu3 %v1371_v49  ;;  %v1395_v45 = vld [vmem:[%s1923_s4] sm:$0xff] }
  0x51   :  { %827 = vmatpush.bf16.msrb.mxu1 %v1388_v47  ;;  %v1405_v49 = vld [vmem:[%s1922_s3] ss:$0 sm:$0xff]  ;;  %s1446_s3 = smov [#allocation2]  }
  0x52   :  { %842 = vmatpush.bf16.msrb.mxu2 %v1394_v63  ;;  %s939_s8 = sshll.u32 %s1446_s3, 4  ;;  %s940_s8 = int_to_ptr.vmem [resolvable:$true] %s939_s8 }
  0x54   :  { %815 = vmatpush.bf16.msrb.mxu0 %v1379_v50  ;;  %803 = vmatpush.bf16.msra.mxu3 %v1370_v53 }
  0x55   :  { %828 = vmatpush.bf16.msrb.mxu1 %v1387_v58 }
  0x56   :  { %843 = vmatpush.bf16.msrb.mxu2 %v1393_v3 }
  0x58   :  { %816 = vmatpush.bf16.msrb.mxu0 %v1378_v54  ;;  %804 = vmatpush.bf16.msra.mxu3 %v1369_v56 }
  0x59   :  { %829 = vmatpush.bf16.msrb.mxu1 %v1386_v0  ;;  %v1406_v0 = vld [vmem:[%s1924_s5] ss:$0 sm:$0xff] }
  0x5a   :  { %844 = vmatpush.bf16.msrb.mxu2 %v1392_v8 }
  0x5c   :  { %817 = vmatpush.bf16.msrb.mxu0 %v1377_v57  ;;  %805 = vmatpush.bf16.msra.mxu3 %v1368_v61 }
  0x5d   :  { %830 = vmatpush.bf16.msrb.mxu1 %v1385_v4 }
  0x60   :  { %818 = vmatpush.bf16.msrb.mxu0 %v1376_v62  ;;  %920 = vmatpush.bf16.msrb.mxu3 %v1402_v12 }
  0x61   :  { %831 = vmatpush.bf16.msrb.mxu1 %v1384_v9 }
  0x64   :  { %921 = vmatpush.bf16.msrb.mxu3 %v1401_v39 }
  0x68   :  { %922 = vmatpush.bf16.msrb.mxu3 %v1400_v40 }
  0x6c   :  { %923 = vmatpush.bf16.msrb.mxu3 %v1399_v41 }
  0x70   :  { %924 = vmatpush.bf16.msrb.mxu3 %v1398_v42 }
  0x74   :  { %925 = vmatpush.bf16.msrb.mxu3 %v1397_v43 }
  0x78   :  { %926 = vmatpush.bf16.msrb.mxu3 %v1396_v44 }
  0x7c   :  { %927 = vmatpush.bf16.msrb.mxu3 %v1395_v45 }
  0x98   :  { %v201_v59 = vpop.f32.mrf.mxu0  ;;  %v214_v60 = vpop.f32.mrf.mxu1 }
  0xa0   :  { %v203_v5 = vpop.f32.mrf.mxu0  ;;  %v216_v7 = vpop.f32.mrf.mxu1 }
  0xa1   :  { %v227_v1 = vpop.f32.mrf.mxu2  ;;  %v240_v2 = vpop.f32.mrf.mxu3 }
  0xa9   :  { %v229_v10 = vpop.f32.mrf.mxu2  ;;  %v242_v11 = vpop.f32.mrf.mxu3 }
  0xac   :  { %v253_v6 = vpop.f32.mrf.mxu0  ;;  %v426_v13 = vpop.f32.mrf.mxu1 }
  0xad   :  { %v482_v14 = vmax.f32 %v201_v59, %v426_v13 }
  0xaf   :  { %1407 = vtanh.f32 %v482_v14 }
  0xb4   :  { %v439_v15 = vpop.f32.mrf.mxu2  ;;  %v452_v16 = vpop.f32.mrf.mxu3 }
  0xb5   :  { %v483_v17 = vmax.f32 %v214_v60, %v439_v15  ;;  %v484_v18 = vmax.f32 %v227_v1, %v452_v16  ;;  %v255_v19 = vpop.f32.mrf.mxu0  ;;  %v428_v20 = vpop.f32.mrf.mxu1 }
  0xb6   :  { %v1408_v21 = vpop.eup %1407 }
  0xb7   :  { %v492_v22 = vpack.c.bf16 %v1408_v21, %v1408_v21  ;;  %1409 = vtanh.f32 %v483_v17 }
  0xb8   :  { %1411 = vtanh.f32 %v484_v18 }
  0xb9   :  { %793 = vmatmul.bf16.vlgmr.msra.gmra.mxu2 %v492_v22 }
  0xbc   :  { %v441_v23 = vpop.f32.mrf.mxu2  ;;  %v454_v25 = vpop.f32.mrf.mxu3 }
  0xbd   :  { %v1410_v26 = vpop.eup %1409 }
  0xbe   :  { %v1412_v27 = vpop.eup %1411  ;;  %v493_v28 = vpack.c.bf16 %v1410_v26, %v1410_v26 }
  0xbf   :  { %v494_v29 = vpack.c.bf16 %v1412_v27, %v1412_v27 }
  0xc0   :  { %v465_v30 = vpop.f32.mrf.mxu0  ;;  %v478_v31 = vpop.f32.mrf.mxu1  ;;  %806 = vmatmul.bf16.vlgmr.msra.gmra.mxu3 %v493_v28 }
  0xc1   :  { %v485_v32 = vmax.f32 %v240_v2, %v465_v30  ;;  %v486_v33 = vmax.f32 %v253_v6, %v478_v31  ;;  %819 = vmatmul.bf16.vlgmr.msrb.gmra.mxu0 %v494_v29 }
  0xc3   :  { %1413 = vtanh.f32 %v485_v32 }
  0xc4   :  { %1415 = vtanh.f32 %v486_v33 }
  0xc8   :  { %v467_v34 = vpop.f32.mrf.mxu0  ;;  %v480_v35 = vpop.f32.mrf.mxu1 }
  0xc9   :  { %v1414_v36 = vpop.eup %1413 }
  0xca   :  { %v1416_v37 = vpop.eup %1415  ;;  %v495_v24 = vpack.c.bf16 %v1414_v36, %v1414_v36 }
  0xcb   :  { %v496_v38 = vpack.c.bf16 %v1416_v37, %v1416_v37 }
  0xcc   :  { %832 = vmatmul.bf16.vlgmr.msrb.gmra.mxu1 %v495_v24 }
  0xcd   :  { %1287 = vmatmul.msk.bf16.vlgmr.msrb.gmra.mxu2 %vm781_vm2, %v496_v38 }
 0x13c   :  { %v794_v46 = vpop.f32.mrf.mxu2 }
 0x13d   :  { %v795_v51 = vadd.f32 %v1405_v49, %v794_v46 }
 0x13e   :  { %v820_v48 = vpop.f32.mrf.mxu0 }
 0x143   :  { %v807_v50 = vpop.f32.mrf.mxu3 }
 0x144   :  { %v796_v52 = vpop.f32.mrf.mxu2  ;;  %v808_v53 = vadd.f32 %v807_v50, %v795_v51 }
 0x146   :  { %v822_v54 = vpop.f32.mrf.mxu0  ;;  %v821_v47 = vadd.f32 %v820_v48, %v808_v53 }
 0x149   :  { %v833_v55 = vpop.f32.mrf.mxu1 }
 0x14a   :  { %v834_v57 = vadd.f32 %v833_v55, %v821_v47 }
 0x14b   :  { %v809_v56 = vpop.f32.mrf.mxu3 }
 0x150   :  { %v846_v58 = vpop.f32.mrf.mxu2 }
 0x151   :  { %v847_v59 = vadd.f32 %v846_v58, %v834_v57  ;;  %v835_v60 = vpop.f32.mrf.mxu1 }
 0x153   :  { %1417 = vtanh.f32 %v847_v59 }
 0x158   :  { %v848_v61 = vpop.f32.mrf.mxu2 }
 0x159   :  { %v1418_v62 = vpop.eup %1417 }
 0x15a   :  { %v851_v63 = vpack.c.bf16 %v1418_v62, %v1418_v62 }
 0x15c   :  { %928 = vmatmul.bf16.vlgmr.msrb.gmra.mxu3 %v851_v63 }
 0x1df   :  { %v929_v1 = vpop.f32.mrf.mxu3 }
 0x1e0   :  { %v930_v2 = vadd.f32 %v1406_v0, %v929_v1 }
 0x1e2   :  { %933 = vst [vmem:[#allocation2] sm:$0xf] %v930_v2 }
 0x1e3   :  { %944 = dma.vmem_to_hbm [thread:$0]  %s940_s8, 64, %s942_s11, [#allocation3]  }
 0x1e7   :  { %v931_v3 = vpop.f32.mrf.mxu3 }
 0x1e8   :  { %1443 = dma.done.wait [#allocation3], 64  }
 0x1e9   :  { %1444 = vsyncadd [#allocation3], 4294967232 }
 0x1ea   :  { %949 = vsyncpa [#allocation3], 1 }

</bundles_post_ra>
